<compile_context>
chip_gen: v5e
topology: v5e:2x2
jax: 0.10.0
libtpu: 0.0.40
codegen_flags: <defaults>
</compile_context>

<pallas_src>
import math
import functools

import jax
import jax.numpy as jnp
from jax import lax
from jax.experimental import pallas as pl
from jax.experimental.pallas import tpu as pltpu


def _attention_kernel(*refs, head_size, mxu_dtype, self_attn):
    Dh = head_size
    if self_attn:
        x_ref, w_ref, b_ref, o_ref = refs
        Bt, S, E = x_ref.shape
    else:
        q_ref, k_ref, v_ref, w_ref, b_ref, o_ref = refs
        Bt, S, E = q_ref.shape

    w = w_ref[...]                                   # (E, 3*Dh), f32, VMEM-resident
    b = b_ref[...]                                   # (1, 3*Dh), f32
    scale = jnp.float32(1.0 / math.sqrt(Dh))

    def mm(a, bm):
        return jnp.dot(a.astype(mxu_dtype), bm.astype(mxu_dtype),
                       preferred_element_type=jnp.float32)

    if self_attn:
        # One streamed activation; one fused (Bt*S, E) x (E, 3*Dh) projection matmul.
        x2 = x_ref[...].reshape(Bt * S, E)
        qkv = mm(x2, w) + b                          # (Bt*S, 3*Dh), f32 accumulation
        qkv = qkv.reshape(Bt, S, 3 * Dh)
        Q = qkv[:, :, :Dh] * scale                   # fold 1/sqrt(Dh) into the small tensor
        K = qkv[:, :, Dh:2 * Dh]
        V = qkv[:, :, 2 * Dh:]
    else:
        Q = (mm(q_ref[...].reshape(Bt * S, E), w[:, :Dh]) + b[:, :Dh]
             ).reshape(Bt, S, Dh) * scale
        K = (mm(k_ref[...].reshape(Bt * S, E), w[:, Dh:2 * Dh]) + b[:, Dh:2 * Dh]
             ).reshape(Bt, S, Dh)
        V = (mm(v_ref[...].reshape(Bt * S, E), w[:, 2 * Dh:]) + b[:, 2 * Dh:]
             ).reshape(Bt, S, Dh)

    # scores = Q @ K^T (batched over Bt) without materializing a transpose.
    # TODO(synk): for S >~ 2k, switch to an inner KV-block loop with online softmax
    # (flash-style) so the (S, S) scores never live whole in VMEM (matters on v7x's 64 MiB).
    scores = lax.dot_general(
        Q.astype(mxu_dtype), K.astype(mxu_dtype),
        dimension_numbers=(((2,), (2,)), ((0,), (0,))),
        preferred_element_type=jnp.float32)          # (Bt, S, S)

    # Numerically-stable softmax, kept in f32, with deferred normalization.
    m = jnp.max(scores, axis=-1, keepdims=True)
    e = jnp.exp(scores - m)                          # (Bt, S, S), unnormalized probs
    denom = jnp.sum(e, axis=-1, keepdims=True)       # (Bt, S, 1)

    # TODO(synk): attention dropout omitted (eval mode / p = 0).

    out = lax.dot_general(
        e.astype(mxu_dtype), V.astype(mxu_dtype),
        dimension_numbers=(((2,), (1,)), ((0,), (0,))),
        preferred_element_type=jnp.float32)          # (Bt, S, Dh)
    out = out * pl.reciprocal(denom, approx=True)    # normalize on the small (Bt,S,Dh) tensor
    o_ref[...] = out.astype(o_ref.dtype)


def _pick_block_b(B, requested=None):
    """Pick Bt | B, preferring an even grid length (v7x has two TensorCores)."""
    if requested is not None:
        if B % requested != 0:
            raise ValueError(f"block_b={requested} must divide batch {B}")
        return requested
    for bt in (8, 4, 2, 1):
        if B % bt == 0 and (B // bt) % 2 == 0:
            return bt
    for bt in (8, 4, 2, 1):
        if B % bt == 0:
            return bt
    return 1


def _vmem_budget_bytes(Bt, S, E, Dh, n_act_inputs, stream_bytes):
    f32 = 4
    # Double-buffered streamed activation input(s) and output blocks.
    acts = 2 * (n_act_inputs * Bt * S * E + Bt * S * Dh) * stream_bytes
    # Weights/bias are constant-index but still double-buffered by the pipeline.
    weights = 2 * (E * 3 * Dh + 3 * Dh) * f32
    # In-kernel f32 temporaries: fused qkv, Q/K/V, scores + e, out (pre/post normalize).
    temps = (Bt * S * 3 * Dh + 3 * Bt * S * Dh + 2 * Bt * S * S + 2 * Bt * S * Dh) * f32
    budget = int(1.5 * (acts + weights + temps)) + (4 << 20)
    return min(budget, 48 * 1024 * 1024)   # stay well below v7x's 64 MiB physical VMEM


def attention(q, k, v, params, *, mxu_dtype=jnp.bfloat16, stream_dtype=None, block_b=None):
    """Single-head attention. q, k, v: [B, S, E]; returns [B, S, head_size].

    - If q, k, v are the SAME array object (self-attention / ViT), the input is streamed
      once and reused for all three projections.
    - stream_dtype (e.g. jnp.bfloat16) casts activations wrapper-side so they move over
      HBM at half width; softmax math stays f32 inside the kernel. Output uses that dtype.
    - mxu_dtype controls MXU operand precision (accumulation is always f32).
    """
    B, S, E = q.shape
    Dh = params["wq"].shape[1]
    self_attn = (q is k) and (k is v)

    if stream_dtype is not None:
        q = q.astype(stream_dtype)
        if self_attn:
            k = v = q
        else:
            k = k.astype(stream_dtype)
            v = v.astype(stream_dtype)
    out_dtype = q.dtype

    # Fused QKV projection parameters: (E, 3*Dh) weights, (1, 3*Dh) bias.
    w = jnp.concatenate([params["wq"], params["wk"], params["wv"]], axis=1)
    b = jnp.concatenate([params["bq"], params["bk"], params["bv"]], axis=1)

    Bt = _pick_block_b(B, block_b)
    grid = (B // Bt,)

    act_spec = pl.BlockSpec((Bt, S, E), lambda i: (i, 0, 0))
    # Constant block index -> weights/bias DMA'd once, resident in VMEM across the grid.
    w_spec = pl.BlockSpec((E, 3 * Dh), lambda i: (0, 0))
    b_spec = pl.BlockSpec((1, 3 * Dh), lambda i: (0, 0))
    out_spec = pl.BlockSpec((Bt, S, Dh), lambda i: (i, 0, 0))

    n_act = 1 if self_attn else 3
    in_specs = [act_spec] * n_act + [w_spec, b_spec]
    inputs = ((q,) if self_attn else (q, k, v)) + (w, b)

    kernel = functools.partial(_attention_kernel, head_size=Dh,
                               mxu_dtype=mxu_dtype, self_attn=self_attn)
    stream_bytes = jnp.dtype(out_dtype).itemsize

    return pl.pallas_call(
        kernel,
        out_shape=jax.ShapeDtypeStruct((B, S, Dh), out_dtype),
        grid_spec=pltpu.PrefetchScalarGridSpec(
            num_scalar_prefetch=0,
            grid=grid,
            in_specs=in_specs,
            out_specs=out_spec,
        ),
        compiler_params=pltpu.CompilerParams(
            dimension_semantics=("parallel",),        # batch axis only; no reduction axis
            vmem_limit_bytes=_vmem_budget_bytes(Bt, S, E, Dh, n_act, stream_bytes)),
    )(*inputs)


def _reference(q, k, v, params, head_size):
    """Pure-JAX reference mirroring the PyTorch module (eval mode, dropout=0)."""
    Q = q @ params["wq"] + params["bq"]
    K = k @ params["wk"] + params["bk"]
    V = v @ params["wv"] + params["bv"]
    s = jnp.einsum("bqd,bkd->bqk", Q, K) / math.sqrt(head_size)
    p = jax.nn.softmax(s, axis=-1)
    return jnp.einsum("bqk,bkd->bqd", p, V)


def init_params(key, embed_size, head_size):
    ks = jax.random.split(key, 6)
    scale = 1.0 / math.sqrt(embed_size)
    return {
        # weights stored as [in, out] (already transposed vs. PyTorch's [out, in])
        "wq": jax.random.normal(ks[0], (embed_size, head_size), jnp.float32) * scale,
        "bq": jax.random.normal(ks[1], (1, head_size), jnp.float32) * 0.02,
        "wk": jax.random.normal(ks[2], (embed_size, head_size), jnp.float32) * scale,
        "bk": jax.random.normal(ks[3], (1, head_size), jnp.float32) * 0.02,
        "wv": jax.random.normal(ks[4], (embed_size, head_size), jnp.float32) * scale,
        "bv": jax.random.normal(ks[5], (1, head_size), jnp.float32) * 0.02,
    }


if __name__ == "__main__":
    B, S, E, Dh = 2, 8, 32, 32   # batch, num_patches (seq), embed_size, head_size
    # NOTE: smoke-test shapes only; real ViT shapes (S~197, E=768, Dh=64) fill the MXU lanes.

    key = jax.random.PRNGKey(0)
    kq, kk, kv, kx, kp = jax.random.split(key, 5)
    q = jax.random.normal(kq, (B, S, E), jnp.float32)
    k = jax.random.normal(kk, (B, S, E), jnp.float32)
    v = jax.random.normal(kv, (B, S, E), jnp.float32)
    x = jax.random.normal(kx, (B, S, E), jnp.float32)
    params = init_params(kp, E, Dh)

    # Cross-attention path, f32 MXU operands (tight numeric check).
    ref = _reference(q, k, v, params, Dh)
    out = jax.block_until_ready(attention(q, k, v, params, mxu_dtype=jnp.float32))
    assert out.shape == (B, S, Dh)
    assert jnp.allclose(out, ref, atol=1e-2, rtol=1e-2), "cross-attn f32 mismatch vs reference"

    # Self-attention fast path (single streamed input), default bf16 MXU operands.
    ref_self = _reference(x, x, x, params, Dh)
    out_self = jax.block_until_ready(attention(x, x, x, params))
    assert out_self.shape == (B, S, Dh)
    assert jnp.allclose(out_self, ref_self, atol=5e-2, rtol=5e-2), "self-attn mismatch vs reference"

    # Self-attention with bf16 activation streaming (memory-bound fast path).
    out_bf16 = jax.block_until_ready(attention(x, x, x, params, stream_dtype=jnp.bfloat16))
    assert out_bf16.shape == (B, S, Dh) and out_bf16.dtype == jnp.bfloat16
    assert jnp.allclose(out_bf16.astype(jnp.float32), ref_self, atol=1e-1, rtol=1e-1), \
        "self-attn bf16-stream mismatch vs reference"

    print("KERNEL_OK")
</pallas_src>

<mosaic_0001>
module attributes {stable_mosaic.version = 11 : i64} {
  func.func @_attention_kernel(%arg0: i32, %arg1: memref<1x8x32xf32, #tpu.memory_space<vmem>>, %arg2: memref<1x8x32xf32, #tpu.memory_space<vmem>>, %arg3: memref<1x8x32xf32, #tpu.memory_space<vmem>>, %arg4: memref<32x96xf32, #tpu.memory_space<vmem>>, %arg5: memref<1x96xf32, #tpu.memory_space<vmem>>, %arg6: memref<1x8x32xf32, #tpu.memory_space<vmem>>) attributes {dimension_semantics = [#tpu.dimension_semantics<parallel>], iteration_bounds = array<i64: 2>, scalar_prefetch = 0 : i64, scratch_operands = 0 : i64, tpu.core_type = #tpu.core_type<tc>, window_params = [{transform_indices = @transform_0, window_bounds = array<i64: 1, 8, 32>}, {transform_indices = @transform_1, window_bounds = array<i64: 1, 8, 32>}, {transform_indices = @transform_2, window_bounds = array<i64: 1, 8, 32>}, {pipeline_mode = #tpu.pipeline_mode<synchronous>, transform_indices = @transform_3, window_bounds = array<i64: 32, 96>}, {pipeline_mode = #tpu.pipeline_mode<synchronous>, transform_indices = @transform_4, window_bounds = array<i64: 1, 96>}, {transform_indices = @transform_5, window_bounds = array<i64: 1, 8, 32>}]} {
    %c0 = arith.constant 0 : index
    %c0_0 = arith.constant 0 : index
    %0 = vector.load %arg4[%c0, %c0_0] : memref<32x96xf32, #tpu.memory_space<vmem>>, vector<32x96xf32>
    %c0_1 = arith.constant 0 : index
    %c0_2 = arith.constant 0 : index
    %1 = vector.load %arg5[%c0_1, %c0_2] : memref<1x96xf32, #tpu.memory_space<vmem>>, vector<1x96xf32>
    %c0_3 = arith.constant 0 : index
    %c0_4 = arith.constant 0 : index
    %c0_5 = arith.constant 0 : index
    %2 = vector.load %arg1[%c0_3, %c0_4, %c0_5] : memref<1x8x32xf32, #tpu.memory_space<vmem>>, vector<1x8x32xf32>
    %3 = vector.shape_cast %2 : vector<1x8x32xf32> to vector<8x32xf32>
    %4 = vector.extract_strided_slice %0 {offsets = [0, 0], sizes = [32, 32], strides = [1, 1]} : vector<32x96xf32> to vector<32x32xf32>
    %cst = arith.constant dense<0.000000e+00> : vector<8x32xf32>
    %5 = tpu.matmul %3, %4, %cst {dimension_numbers = #tpu.dot_dimension_numbers<[1], [0], [0], [1], [0, 0, 1, 1], [], []>} : vector<8x32xf32>, vector<32x32xf32>, vector<8x32xf32> -> vector<8x32xf32>
    %6 = vector.extract_strided_slice %1 {offsets = [0, 0], sizes = [1, 32], strides = [1, 1]} : vector<1x96xf32> to vector<1x32xf32>
    %7 = vector.broadcast %6 : vector<1x32xf32> to vector<8x32xf32>
    %8 = arith.addf %5, %7 : vector<8x32xf32>
    %9 = vector.shape_cast %8 : vector<8x32xf32> to vector<1x8x32xf32>
    %cst_6 = arith.constant 0.176776692 : f32
    %10 = vector.broadcast %cst_6 : f32 to vector<1x8x32xf32>
    %11 = arith.mulf %9, %10 : vector<1x8x32xf32>
    %c0_7 = arith.constant 0 : index
    %c0_8 = arith.constant 0 : index
    %c0_9 = arith.constant 0 : index
    %12 = vector.load %arg2[%c0_7, %c0_8, %c0_9] : memref<1x8x32xf32, #tpu.memory_space<vmem>>, vector<1x8x32xf32>
    %13 = vector.shape_cast %12 : vector<1x8x32xf32> to vector<8x32xf32>
    %14 = vector.extract_strided_slice %0 {offsets = [0, 32], sizes = [32, 32], strides = [1, 1]} : vector<32x96xf32> to vector<32x32xf32>
    %cst_10 = arith.constant dense<0.000000e+00> : vector<8x32xf32>
    %15 = tpu.matmul %13, %14, %cst_10 {dimension_numbers = #tpu.dot_dimension_numbers<[1], [0], [0], [1], [0, 0, 1, 1], [], []>} : vector<8x32xf32>, vector<32x32xf32>, vector<8x32xf32> -> vector<8x32xf32>
    %16 = vector.extract_strided_slice %1 {offsets = [0, 32], sizes = [1, 32], strides = [1, 1]} : vector<1x96xf32> to vector<1x32xf32>
    %17 = vector.broadcast %16 : vector<1x32xf32> to vector<8x32xf32>
    %18 = arith.addf %15, %17 : vector<8x32xf32>
    %19 = vector.shape_cast %18 : vector<8x32xf32> to vector<1x8x32xf32>
    %c0_11 = arith.constant 0 : index
    %c0_12 = arith.constant 0 : index
    %c0_13 = arith.constant 0 : index
    %20 = vector.load %arg3[%c0_11, %c0_12, %c0_13] : memref<1x8x32xf32, #tpu.memory_space<vmem>>, vector<1x8x32xf32>
    %21 = vector.shape_cast %20 : vector<1x8x32xf32> to vector<8x32xf32>
    %22 = vector.extract_strided_slice %0 {offsets = [0, 64], sizes = [32, 32], strides = [1, 1]} : vector<32x96xf32> to vector<32x32xf32>
    %cst_14 = arith.constant dense<0.000000e+00> : vector<8x32xf32>
    %23 = tpu.matmul %21, %22, %cst_14 {dimension_numbers = #tpu.dot_dimension_numbers<[1], [0], [0], [1], [0, 0, 1, 1], [], []>} : vector<8x32xf32>, vector<32x32xf32>, vector<8x32xf32> -> vector<8x32xf32>
    %24 = vector.extract_strided_slice %1 {offsets = [0, 64], sizes = [1, 32], strides = [1, 1]} : vector<1x96xf32> to vector<1x32xf32>
    %25 = vector.broadcast %24 : vector<1x32xf32> to vector<8x32xf32>
    %26 = arith.addf %23, %25 : vector<8x32xf32>
    %27 = vector.shape_cast %26 : vector<8x32xf32> to vector<1x8x32xf32>
    %cst_15 = arith.constant dense<0.000000e+00> : vector<1x8x8xf32>
    %28 = tpu.matmul %11, %19, %cst_15 {dimension_numbers = #tpu.dot_dimension_numbers<[2], [2], [1], [1], [0, 0, 0, 1, 1, 1], [0], [0]>} : vector<1x8x32xf32>, vector<1x8x32xf32>, vector<1x8x8xf32> -> vector<1x8x8xf32>
    %cst_16 = arith.constant dense<0xFF800000> : vector<1x8xf32>
    %29 = vector.multi_reduction <maximumf>, %28, %cst_16 [2] : vector<1x8x8xf32> to vector<1x8xf32>
    %30 = vector.shape_cast %29 : vector<1x8xf32> to vector<1x8x1xf32>
    %31 = vector.broadcast %30 : vector<1x8x1xf32> to vector<1x8x8xf32>
    %32 = arith.subf %28, %31 : vector<1x8x8xf32>
    %33 = math.exp %32 : vector<1x8x8xf32>
    %cst_17 = arith.constant dense<0.000000e+00> : vector<1x8xf32>
    %34 = vector.multi_reduction <add>, %33, %cst_17 [2] : vector<1x8x8xf32> to vector<1x8xf32>
    %35 = vector.shape_cast %34 : vector<1x8xf32> to vector<1x8x1xf32>
    %cst_18 = arith.constant dense<0.000000e+00> : vector<1x8x32xf32>
    %36 = tpu.matmul %33, %27, %cst_18 {dimension_numbers = #tpu.dot_dimension_numbers<[2], [1], [1], [2], [0, 0, 0, 1, 1, 2], [0], [0]>} : vector<1x8x8xf32>, vector<1x8x32xf32>, vector<1x8x32xf32> -> vector<1x8x32xf32>
    %37 = tpu.reciprocal %35 {approx = true} : vector<1x8x1xf32> -> vector<1x8x1xf32>
    %38 = vector.broadcast %37 : vector<1x8x1xf32> to vector<1x8x32xf32>
    %39 = arith.mulf %36, %38 : vector<1x8x32xf32>
    %c0_19 = arith.constant 0 : index
    %c0_20 = arith.constant 0 : index
    %c0_21 = arith.constant 0 : index
    %40 = vector.load %arg6[%c0_19, %c0_20, %c0_21] : memref<1x8x32xf32, #tpu.memory_space<vmem>>, vector<1x8x32xf32>
    tpu.vector_store %arg6[%c0_19, %c0_20, %c0_21], %39 {strides = array<i32>} : memref<1x8x32xf32, #tpu.memory_space<vmem>>, vector<1x8x32xf32>,
    return
  }
  func.func @transform_0(%arg0: i32) -> (i32, i32, i32) {
    %c0_i32 = arith.constant 0 : i32
    %c0_i32_0 = arith.constant 0 : i32
    %c0_i32_1 = arith.constant 0 : i32
    return %arg0, %c0_i32, %c0_i32_0 : i32, i32, i32
  }
  func.func @transform_1(%arg0: i32) -> (i32, i32, i32) {
    %c0_i32 = arith.constant 0 : i32
    %c0_i32_0 = arith.constant 0 : i32
    %c0_i32_1 = arith.constant 0 : i32
    return %arg0, %c0_i32, %c0_i32_0 : i32, i32, i32
  }
  func.func @transform_2(%arg0: i32) -> (i32, i32, i32) {
    %c0_i32 = arith.constant 0 : i32
    %c0_i32_0 = arith.constant 0 : i32
    %c0_i32_1 = arith.constant 0 : i32
    return %arg0, %c0_i32, %c0_i32_0 : i32, i32, i32
  }
  func.func @transform_3(%arg0: i32) -> (i32, i32) {
    %c0_i32 = arith.constant 0 : i32
    %c0_i32_0 = arith.constant 0 : i32
    %c0_i32_1 = arith.constant 0 : i32
    return %c0_i32, %c0_i32_0 : i32, i32
  }
  func.func @transform_4(%arg0: i32) -> (i32, i32) {
    %c0_i32 = arith.constant 0 : i32
    %c0_i32_0 = arith.constant 0 : i32
    %c0_i32_1 = arith.constant 0 : i32
    return %c0_i32, %c0_i32_0 : i32, i32
  }
  func.func @transform_5(%arg0: i32) -> (i32, i32, i32) {
    %c0_i32 = arith.constant 0 : i32
    %c0_i32_0 = arith.constant 0 : i32
    %c0_i32_1 = arith.constant 0 : i32
    return %arg0, %c0_i32, %c0_i32_0 : i32, i32, i32
  }
}

</mosaic_0001>

<bundles_post_ra>
// kernel: tpu_custom_call.1
= control target key start
LH: loop header
LB: loop body
LE: loop exit
PB: predicated region body
PF: predicated region fallthrough
CT: control target
= control target key end

     0   :  { %s1220_s0 = inlined_call_operand.hbm [shape: f32[2,8,32], index: 0, kind: input, shape index: {}]   ;;  %s1221_s1 = inlined_call_operand.hbm [shape: f32[2,8,32], index: 1, kind: input, shape index: {}]   ;;  %s1222_s2 = inlined_call_operand.hbm [shape: f32[2,8,32], index: 2, kind: input, shape index: {}]   ;;  %s1223_s3 = inlined_call_operand.hbm [shape: f32[32,96], index: 3, kind: input, shape index: {}]   ;;  %s1224_s4 = inlined_call_operand.vmem [shape: f32[1,96], index: 4, kind: input, shape index: {}]   ;;  %s1225_s5 = inlined_call_operand.hbm [shape: f32[2,8,32], index: 5, kind: output, shape index: {}]  }
   0x1   :  { %1230 = sst [smem:[#allocation18_spill]] %s1221_s1 }
   0x2   :  { %1231 = sst [smem:[#allocation19_spill]] %s1223_s3 }
   0x3   :  { %10 = vsyncpa [#allocation3], 0 }
   0x4   :  { %12 = vsyncpa [#allocation3 + $0x1], 0 }
   0x5   :  { %13 = vsyncpa [#allocation6], 0 }
   0x6   :  { %15 = vsyncpa [#allocation6 + $0x1], 0 }
   0x7   :  { %16 = vsyncpa [#allocation9], 0 }
   0x8   :  { %17 = vsyncpa [#allocation4], 0 }
   0x9   :  { %19 = vsyncpa [#allocation4 + $0x1], 0  ;;  %s1004_s18 = smov 0   ;;  %s1006_s19 = smov 0  }
   0xa   :  { %s1008_s20 = smov 0   ;;  %s1010_s21 = smov 0  }
   0xb LB: > { %1232 = sst [smem:[#allocation15_spill]] %s967_s21  ;;  %s1025_s22 = sadd.s32 4294967295, %s967_s21   ;;  %s967_s21 = sphi %s1010_s21, %s1245_s21   ;;  %s963_s20 = sphi %s1008_s20, %s1249_s20   ;;  %s959_s19 = sphi %s1006_s19, %s1248_s19   ;;  %s955_s18 = sphi %s1004_s18, %s1247_s18  }
   0xc   : > { %s651_s23 = sadd.s32 4294967294, %s967_s21   ;;  %s1029_s24 = sadd.s32 1, %s967_s21  }
   0xd   : > { %1233 = sst [smem:[#allocation16_spill]] %s1029_s24  ;;  %s32_s25 = sadd.s32 1, %s963_s20 }
   0xe   : > { %s29_s26 = ssub.s32 %s967_s21, %s1029_s24  ;;  %p39_p0 = scmp.ne.s32.totalorder %s963_s20, %s959_s19 }
   0xf   : > { %p30_p1 = scmp.eq.s32.totalorder %s29_s26, 0  ;;  %p40_p2 = scmp.eq.s32.totalorder %s967_s21, 0 }
  0x10   : > { %p45_p3 = scmp.ne.s32.totalorder %s959_s19, %s955_s18  ;;  %p163_p4 = scmp.eq.s32.totalorder %s1025_s22, 1 }
  0x11   : > { %s1041_s27 = scalar_select %p30_p1, %s963_s20, %s32_s25  }
  0x12   : > { %p41_p5 = por %p40_p2, %p39_p0  ;;  %p1043_p6 = por %p163_p4, %p39_p0 }
  0x13   : > { %1234 = sst [smem:[#allocation17_spill]] %s1041_s27  ;;  %p169_p7 = scmp.eq.s32.totalorder %s651_s23, 1 }
  0x14   : > { %p708_p9 = scmp.lt.s32.totalorder %s967_s21, 2  ;;  %s1226_s30 = sand.u32 1, %s963_s20  }
  0x15   : > { %p1052_p10 = por %p169_p7, %p45_p3  ;;  %s1059_s6 = sshll.u32 %s1226_s30, 3 }
  0x16   : > { %s1062_s7 = sshll.u32 %s967_s21, 3  ;;  %p1064_p11 = pnand %p708_p9, %p41_p5 }
  0x17   : > { %s225_s9 = sand.u32 1, %s967_s21   ;;  %s1238_s1 = sld [smem:[#allocation18_spill]] }
  0x18   : > { %s229_s14 = scalar_lea.vmem [#allocation5], %s1059_s6  ;;  %s1074_s16 = scalar_lea.sflag [#allocation6], %s225_s9 }
  0x19   : > { %s237_s15 = sshll.u32 %s229_s14, 4  ;;  %p777_p13 = pneg %p1064_p11  ;;  %s238_s15 = int_to_ptr.vmem [resolvable:$true] %s237_s15 }
  0x1d   : > { %s233_s12 = scalar_lea.hbm %s1238_s1, %s1062_s7  ;;  %s780_s10 = scalar_lea.hbm %s1238_s1, 16 }
  0x1e   : > { %s235_s13 = sshll.u32 %s233_s12, 4  ;;  %s236_s13 = int_to_ptr.hbm [resolvable:$true] %s235_s13 }
  0x1f   : > { %s773_s17 = sshra.s32 %s236_s13, 4  ;;  %s774_s17 = int_to_ptr.hbm [resolvable:$true] %s773_s17 }
  0x20   : > { %s775_s23 = scalar_lea.hbm %s774_s17, 8  ;;  %p781_p2 = scmp.lt.s32.totalorder %s774_s17, %s1238_s1 }
  0x21   : > { %p776_p12 = scmp.ne.s32.totalorder %s774_s17, %s775_s23  ;;  %p782_p4 = scmp.lt.s32.totalorder %s780_s10, %s775_s23 }
  0x23   : > { %p778_p0 = pnand %p777_p13, %p776_p12  ;;  %p783_p5 = por %p782_p4, %p781_p2 }
  0x25   : > { %p779_p1 = pneg %p778_p0 }
  0x27   : > { %p784_p7 = pnand %p783_p5, %p779_p1 }
  0x29   : > { %787 = shalt.err (!%p784_p7)
}
  0x2a   : > { %699 = dma.hbm_to_vmem [thread:$0]  (!%p1064_p11), %s236_s13, 128, %s238_s15, %s1074_s16  }
  0x2b   : > { %p46_p9 = scmp.eq.s32.totalorder %s1025_s22, 0  ;;  %p652_p12 = scmp.ge.s32.totalorder %s967_s21, 1 }
  0x2c   : > { %p176_p0 = scmp.lt.s32.totalorder %s967_s21, 3  ;;  %s1239_s3 = sld [smem:[#allocation19_spill]] }
  0x2d   : > { %p1101_p1 = por %p46_p9, %p45_p3  ;;  %s969_s13 = smov [#allocation8]  }
  0x2e   : > { %p1105_p2 = pnand %p652_p12, %p176_p0  ;;  %s189_s15 = sshll.u32 %s969_s13, 4  ;;  %s190_s15 = int_to_ptr.vmem [resolvable:$true] %s189_s15 }
  0x2f   : > { %s214_s11 = scalar_lea.hbm %s1220_s0, %s1062_s7  ;;  %s210_s12 = scalar_lea.vmem [#allocation2], %s1059_s6 }
  0x30   : > { %p689_p4 = pneg %p1105_p2  ;;  %s218_s9 = sshll.u32 %s210_s12, 4  ;;  %s219_s9 = int_to_ptr.vmem [resolvable:$true] %s218_s9 }
  0x31   : > { %s216_s14 = sshll.u32 %s214_s11, 4  ;;  %s970_s30 = smov 128   ;;  %s217_s14 = int_to_ptr.hbm [resolvable:$true] %s216_s14 }
  0x32   : > { %s187_s17 = sshll.u32 %s1239_s3, 4  ;;  %p690_p5 = pnand %p689_p4, %p46_p9  ;;  %s188_s17 = int_to_ptr.hbm [resolvable:$true] %s187_s17 }
  0x33   : > { %s971_s1 = smov 8   ;;  %s1242_s3 = sand.u32 1, %s963_s20  }
  0x34   : > { %692 = dma.hbm_to_vmem [thread:$0]  (!%p690_p5), %s188_s17, 512, %s190_s15, [#allocation9], %s970_s30, %s970_s30, %s971_s1  }
  0x35   : > { %s207_s13 = scalar_lea.sflag [#allocation3], %s1242_s3  ;;  %s833_s27 = sshra.s32 %s217_s14, 4  ;;  %s834_s27 = int_to_ptr.hbm [resolvable:$true] %s833_s27 }
  0x36   : > { %s835_s24 = scalar_lea.hbm %s834_s27, 8  ;;  %s840_s12 = scalar_lea.hbm %s1220_s0, 16 }
  0x37   : > { %p836_p3 = scmp.ne.s32.totalorder %s834_s27, %s835_s24  ;;  %p841_p0 = scmp.lt.s32.totalorder %s834_s27, %s1220_s0 }
  0x38   : > { %p842_p4 = scmp.lt.s32.totalorder %s840_s12, %s835_s24 }
  0x39   : > { %p838_p7 = pnand %p836_p3, %p777_p13 }
  0x3a   : > { %p843_p5 = por %p842_p4, %p841_p0 }
  0x3b   : > { %p839_p12 = pneg %p838_p7 }
  0x3d   : > { %p844_p8 = pnand %p843_p5, %p839_p12 }
  0x3f   : > { %847 = shalt.err (!%p844_p8)
}
  0x40   : > { %696 = dma.hbm_to_vmem [thread:$0]  (!%p1064_p11), %s217_s14, 128, %s219_s9, %s207_s13  }
  0x41   : > { %s252_s30 = scalar_lea.hbm %s1222_s2, %s1062_s7  ;;  %s248_s15 = scalar_lea.vmem [#allocation7], %s1059_s6 }
  0x42   : > { %s254_s17 = sshll.u32 %s252_s30, 4  ;;  %s256_s26 = sshll.u32 %s248_s15, 4  ;;  %s255_s17 = int_to_ptr.hbm [resolvable:$true] %s254_s17  ;;  %s257_s26 = int_to_ptr.vmem [resolvable:$true] %s256_s26 }
  0x43   : > { %s863_s21 = sshra.s32 %s255_s17, 4  ;;  %s870_s9 = scalar_lea.hbm %s1222_s2, 16  ;;  %s864_s21 = int_to_ptr.hbm [resolvable:$true] %s863_s21 }
  0x44   : > { %s865_s24 = scalar_lea.hbm %s864_s21, 8  ;;  %p871_p12 = scmp.lt.s32.totalorder %s864_s21, %s1222_s2 }
  0x45   : > { %p866_p3 = scmp.ne.s32.totalorder %s864_s21, %s865_s24  ;;  %p872_p0 = scmp.lt.s32.totalorder %s870_s9, %s865_s24 }
  0x47   : > { %p868_p8 = pnand %p866_p3, %p777_p13  ;;  %p873_p4 = por %p872_p0, %p871_p12 }
  0x49   : > { %p869_p7 = pneg %p868_p8 }
  0x4b   : > { %p874_p5 = pnand %p873_p4, %p869_p7 }
  0x4d   : > { %877 = shalt.err (!%p874_p5)
}
  0x4e   : > { %702 = dma.hbm_to_vmem [thread:$0]  (!%p1064_p11), %s255_s17, 128, %s257_s26, %s1074_s16  }
  0x4f   : > { %265 = sbr.rel (%p1105_p2) target bundleno = 749 (0x2ed), region = 40  ;;  %s1151_s6 = sand.u32 (!%p1105_p2), 1, %s959_s19  }
  0x50   : > { %s1154_s7 = sshll.u32 (!%p1105_p2), %s1151_s6, 3  ;;  %s268_s12 = scalar_lea.sflag (!%p1105_p2), [#allocation3], %s1151_s6 }
  0x51   : > { %s271_s11 = scalar_lea.vmem (!%p1105_p2), [#allocation2], %s1154_s7 }
  0x54   : > { %938 = dma.done.wait (%p1101_p1), %s268_s12, 128  }
  0x55   : > { %940 = vsyncadd (%p1101_p1), %s268_s12, 4294967168  ;;  %s277_s8 = sand.u32 1, %s1025_s22   ;;  %s281_s25 = scalar_lea.vmem [#allocation5], %s1154_s7 }
  0x56   : > { %s278_s16 = scalar_lea.sflag [#allocation6], %s277_s8 }
  0x57   : > { %942 = dma.done.wait (%p1101_p1), %s278_s16, 256  }
  0x58   : > { %944 = vsyncadd (%p1101_p1), %s278_s16, 4294967040  ;;  %s291_s1 = scalar_lea.vmem [#allocation7], %s1154_s7 }
  0x59   : > { %946 = dma.done.wait (%p46_p9), [#allocation9], 512  }
  0x5a   : > { %948 = vsyncadd (%p46_p9), [#allocation9], 4294966784  ;;  %v336_v0 = vld [vmem:[#allocation8 + $0x10] sm:$0xff]  ;;  %v337_v1 = vld [vmem:[#allocation8 + $0x18] sm:$0xff]  ;;  %s972_s3 = smov 96   ;;  %vm343_vm0 = vcmask 261120  }
  0x5b   : > { %v748_v2 = vpack.i.bf16 %v336_v0, %v337_v1  ;;  %359 = vmatpush.msra.mxu0 %v337_v1  ;;  %v334_v3 = vld [vmem:[#allocation8] sm:$0xff]  ;;  %v335_v4 = vld [vmem:[#allocation8 + $0x8] sm:$0xff]  ;;  %v339_v6 = vld [vmem:[%s271_s11] sm:$0xff]  ;;  %s973_s17 = smov 64   ;;  %vm476_vm1 = vcmask 64512   ;;  %s674_s15 = sshll.u32 %s1025_s22, 3 }
  0x5c   : > { %v753_v5 = vpack.i.bf16 %v334_v3, %v335_v4  ;;  %v768_v7 = vld [vmem:[%s1224_s4] ss:$0 sm:$0xff]  ;;  %v368_v14 = vld [vmem:[%s281_s25] sm:$0xff]  ;;  %s523_s24 = scalar_lea.hbm %s1225_s5, %s674_s15  ;;  %s333_s27 = scalar_lea.vmem [#allocation10], %s1154_s7 }
  0x5d   : > { %749 = vrot.lane.b32.xlu0 %v748_v2, %s972_s3  ;;  %360 = vmatpush.msra.mxu0 %v336_v0  ;;  %v411_v27 = vld [vmem:[%s291_s1] sm:$0xff]  ;;  %s525_s10 = sshll.u32 %s333_s27, 4  ;;  %s527_s9 = sshll.u32 %s523_s24, 4  ;;  %s526_s10 = int_to_ptr.vmem [resolvable:$true] %s525_s10  ;;  %s528_s9 = int_to_ptr.hbm [resolvable:$true] %s527_s9 }
  0x5e   : > { %385 = vrot.lane.b32.xlu1 %v768_v7, %s972_s3  ;;  %764 = vrot.lane.b32.xlu2 %v753_v5, %s973_s17  ;;  %s513_s14 = scalar_lea.sflag [#allocation4], %s1151_s6  ;;  %s907_s13 = sshra.s32 %s528_s9, 4  ;;  %s908_s13 = int_to_ptr.hbm [resolvable:$true] %s907_s13 }
  0x5f   : > { %361 = vmatpush.msra.mxu0 %v335_v4  ;;  %s909_s22 = scalar_lea.hbm %s908_s13, 8  ;;  %s913_s7 = scalar_lea.hbm %s1225_s5, 16 }
  0x60   : > { %p910_p11 = scmp.ne.s32.totalorder %s908_s13, %s909_s22  ;;  %p914_p1 = scmp.lt.s32.totalorder %s908_s13, %s1225_s5 }
  0x61   : > { %362 = vmatpush.msra.mxu0 %v334_v3  ;;  %p915_p2 = scmp.lt.s32.totalorder %s913_s7, %s909_s22 }
  0x62   : > { %667 = vmatmul.msk.f32.vlgmr.msra.gmra.mxu0 %vm343_vm0, %v339_v6  ;;  %p911_p13 = pnand %p910_p11, %p1043_p6 }
  0x63   : > { %p916_p3 = por %p915_p2, %p914_p1 }
  0x64   : > { %p912_p9 = pneg %p911_p13 }
  0x65   : > { %754 = vrot.lane.b32.xlu0 %v753_v5, %s972_s3 }
  0x66   : > { %759 = vrot.lane.b32.xlu1 %v748_v2, %s973_s17  ;;  %p917_p8 = pnand %p916_p3, %p912_p9 }
  0x6d   : > { %424 = vrot.lane.b32.xlu0 %v768_v7, %s973_s17 }
  0xb8   : > { %v765_v24 = vpop.permute.xlu2 %764 }
  0xb9   : > { %v766_v25 = vunpack.i.l.bf16 %v765_v24  ;;  %v767_v26 = vunpack.i.h.bf16 %v765_v24 }
  0xcf   : > { %v750_v8 = vpop.permute.xlu0 %749 }
  0xd0   : > { %v751_v9 = vunpack.i.l.bf16 %v750_v8  ;;  %v752_v10 = vunpack.i.h.bf16 %v750_v8  ;;  %v386_v15 = vpop.permute.xlu1 %385 }
  0xd2   : > { %403 = vmatpush.msra.mxu1 %v751_v9 }
  0xd4   : > { %404 = vmatpush.msra.mxu1 %v752_v10 }
  0xd7   : > { %v755_v11 = vpop.permute.xlu0 %754 }
  0xd8   : > { %v756_v12 = vunpack.i.l.bf16 %v755_v11  ;;  %v757_v13 = vunpack.i.h.bf16 %v755_v11  ;;  %v760_v16 = vpop.permute.xlu1 %759 }
  0xd9   : > { %v761_v17 = vunpack.i.l.bf16 %v760_v16  ;;  %v762_v23 = vunpack.i.h.bf16 %v760_v16 }
  0xda   : > { %405 = vmatpush.msra.mxu1 %v756_v12 }
  0xdb   : > { %442 = vmatpush.msra.mxu2 %v761_v17 }
  0xdc   : > { %406 = vmatpush.msra.mxu1 %v757_v13 }
  0xdd   : > { %668 = vmatmul.msk.f32.vlgmr.msra.gmra.mxu1 %vm343_vm0, %v368_v14  ;;  %443 = vmatpush.msra.mxu2 %v762_v23 }
  0xdf   : > { %v364_v18 = vpop.f32.mrf.mxu0  ;;  %444 = vmatpush.msra.mxu2 %v766_v25  ;;  %v425_v31 = vpop.permute.xlu0 %424 }
  0xe0   : > { %v365_v19 = vadd.f32 %v768_v7, %v364_v18 }
  0xe1   : > { %445 = vmatpush.msra.mxu2 %v767_v26 }
  0xe2   : > { %v367_v22 = vmul.f32 0.17677669, %v365_v19  ;;  %669 = vmatmul.msk.f32.vlgmr.msra.gmra.mxu2 %vm343_vm0, %v411_v27 }
 0x15a   : > { %v408_v20 = vpop.f32.mrf.mxu1 }
 0x15b   : > { %v409_v21 = vadd.f32 %v408_v20, %v386_v15 }
 0x15d   : > { %670 = vmatpush.xpose.msk.msra.mxu3 %vm343_vm0, %v409_v21 }
 0x160   : > { %671 = vmatmul.msk.f32.vlgmr.msra.gmra.mxu3 %vm343_vm0, %v367_v22 }
 0x165   : > { %v447_v30 = vpop.f32.mrf.mxu2 }
 0x166   : > { %v448_v32 = vadd.f32 %v447_v30, %v425_v31 }
 0x168   : > { %504 = vmatpush.msrb.mxu3 %v448_v32 }
 0x1e3   : > { %v473_v28 = vpop.f32.mrf.mxu3 }
 0x1e4   : > { %v477_v29 = vsel %vm476_vm1, %v473_v28, -inf }
 0x1e5   : > { %478 = vmax.xlane.f32.xlu2 %v477_v29 }
 0x258   : > { %v479_v33 = vpop.xlane.xlu2 %478 }
 0x259   : > { %v480_v34 = vsub.f32 %v473_v28, %v479_v33 }
 0x25b   : > { %v481_v35 = vmul.f32 1.442695, %v480_v34 }
 0x25d   : > { %769 = vpow2.f32 %v481_v35 }
 0x263   : > { %v770_v36 = vpop.eup %769 }
 0x264   : > { %672 = vmatmul.msk.f32.vlgmr.msrb.gmra.mxu3 %vm476_vm1, %v770_v36  ;;  %v483_v37 = vsel %vm476_vm1, %v770_v36, 0.0 }
 0x265   : > { %484 = vadd.xlane.f32.xlu1 %v483_v37 }
 0x2d8   : > { %v485_v38 = vpop.xlane.xlu1 %484 }
 0x2d9   : > { %771 = vrcp.f32 %v485_v38 }
 0x2df   : > { %v772_v39 = vpop.eup %771 }
 0x2e7   : > { %v506_v40 = vpop.f32.mrf.mxu3 }
 0x2e8   : > { %v510_v41 = vmul.f32 %v772_v39, %v506_v40 }
 0x2ea   : > { %511 = vst.msk [vmem:[%s333_s27] sm:$0xff] %vm343_vm0, %v510_v41 }
 0x2eb   : > { %920 = shalt.err (!%p917_p8)
}
 0x2ec   : > { %687 = dma.vmem_to_hbm [thread:$0]  (%p1043_p6), %s526_s10, 128, %s528_s9, %s513_s14  }
 0x2ed PF: > { %s1243_s6 = sld [smem:[#allocation15_spill]]  ;;  %s539_s25 = sand.u32 1, %s955_s18  }
 0x2ee   : > { %s540_s1 = scalar_lea.sflag [#allocation4], %s539_s25 }
 0x2f3   : > { %p1244_p7 = scmp.ge.s32.totalorder %s1243_s6, 2 }
 0x2f5   : > { %p704_p12 = pnand %p1244_p7, %p1052_p10 }
 0x2f7   : > { %p705_p0 = pneg %p704_p12 }
 0x2f9   : > { %950 = dma.done.wait (%p705_p0), %s540_s1, 128  }
 0x2fa   : > { %952 = vsyncadd (%p705_p0), %s540_s1, 4294967168  ;;  %s1245_s21 = sld [smem:[#allocation16_spill]]  ;;  %s1247_s18 = smov %s959_s19 }
 0x2fb   : > { %s1246_s3 = sld [smem:[#allocation17_spill]]  ;;  %s1248_s19 = smov %s963_s20 }
 0x300   : > { %p22_p4 = scmp.ge.s32.totalorder %s1245_s21, 4  }
 0x301   : > { %s1249_s20 = smov %s1246_s3 }
 0x302   :  { %24 = sbr.rel (!%p22_p4) target bundleno = 11 (0xb), region = 113 }
 0x307   :  { %546 = vsyncpa [#allocation3], 1 }
 0x308   :  { %548 = vsyncpa [#allocation3 + $0x1], 1 }
 0x309   :  { %549 = vsyncpa [#allocation6], 1 }
 0x30a   :  { %551 = vsyncpa [#allocation6 + $0x1], 1 }
 0x30b   :  { %552 = vsyncpa [#allocation9], 1 }
 0x30c   :  { %553 = vsyncpa [#allocation4], 1 }
 0x30d   :  { %555 = vsyncpa [#allocation4 + $0x1], 1 }

</bundles_post_ra>
